<compile_context>
chip_gen: v6e
topology: v6e:2x2x1
jax: 0.10.0
libtpu: 0.0.40
codegen_flags: <defaults>
</compile_context>

<pallas_src>
import jax
import jax.numpy as jnp
import numpy as np
from jax.experimental import pallas as pl
from jax.experimental.pallas import tpu as pltpu

# Full f32 precision for the (host-side) algebraic weight fold and the pure-JAX reference,
# so the comparison against the f32 kernel is meaningful.
jax.config.update("jax_default_matmul_precision", "highest")

BN_EPS = 1e-5


# ------------------------------------------------------------------
# Single fused kernel: pool + (folded) image head, meta MLP, concat + l0
# ------------------------------------------------------------------
def fused_head_kernel(feat_ref, w_img_ref,
                      meta_ref, wm1t_ref, bm1_ref, g1_ref, be1_ref,
                      wm2t_ref, bm2_ref, g2_ref, be2_ref,
                      w0f_ref, bout_ref, out_ref):
    # ---- image branch ----
    # feat_ref: (bs, hw, C) — C on lanes, hw on sublanes; pooling is a sublane reduce.
    pooled = jnp.mean(feat_ref[...], axis=1)                                # (bs, C)
    # Folded l1∘l0 x-path: VPU multiply + XLU lane reduce (no MXU N=1 matmul).
    x_img = jnp.sum(pooled * w_img_ref[0, :], axis=-1, keepdims=True)       # (bs, 1)

    # ---- meta branch: Linear -> BN(batch stats) -> ReLU -> Linear -> BN -> ReLU ----
    m = meta_ref[...]                                                       # (bs, 11)
    h = jnp.dot(m, wm1t_ref[...], preferred_element_type=jnp.float32) + bm1_ref[0, :]
    mu = jnp.mean(h, axis=0, keepdims=True)
    var = jnp.mean(jnp.square(h - mu), axis=0, keepdims=True)
    h = (h - mu) * jax.lax.rsqrt(var + BN_EPS) * g1_ref[0, :] + be1_ref[0, :]
    h = jnp.maximum(h, 0.0)

    h2 = jnp.dot(h, wm2t_ref[...], preferred_element_type=jnp.float32) + bm2_ref[0, :]
    mu2 = jnp.mean(h2, axis=0, keepdims=True)
    var2 = jnp.mean(jnp.square(h2 - mu2), axis=0, keepdims=True)
    f = (h2 - mu2) * jax.lax.rsqrt(var2 + BN_EPS) * g2_ref[0, :] + be2_ref[0, :]
    f = jnp.maximum(f, 0.0)                                                 # (bs, 11)

    # ---- head: cat((x, f), 1) @ w0.T + b0, as split contributions ----
    f_contrib = jnp.sum(f * w0f_ref[0, :], axis=-1, keepdims=True)          # (bs, 1)
    out_ref[...] = x_img + f_contrib + bout_ref[...]


def res50_meta_forward(feat_nchw, meta, p):
    bs, c, h, w = feat_nchw.shape
    hw = h * w
    # NCHW -> (bs, hw, C): channels on the 128-lane axis (no 124/128-lane padding waste).
    feat = jnp.transpose(feat_nchw.reshape(bs, c, hw), (0, 2, 1))

    # Algebraic fold of l1 followed by the x-slice of l0 (no nonlinearity in between).
    n_l1 = p["w1"].shape[0]                                   # 1024
    w0x = p["w0"][:, :n_l1]                                   # (1, 1024)
    w0f = p["w0"][:, n_l1:]                                   # (1, 11)
    w_img = w0x @ p["w1"]                                     # (1, 2048)
    b_out = (w0x @ p["b1"] + p["b0"]).reshape(1, 1)           # folded b1 contribution + b0

    args = (
        feat, w_img,
        meta,
        jnp.transpose(p["wm1"]), p["bm1"].reshape(1, -1),
        p["g1"].reshape(1, -1), p["be1"].reshape(1, -1),
        jnp.transpose(p["wm2"]), p["bm2"].reshape(1, -1),
        p["g2"].reshape(1, -1), p["be2"].reshape(1, -1),
        w0f, b_out,
    )
    vmem = pl.BlockSpec(memory_space=pltpu.MemorySpace.VMEM)
    return pl.pallas_call(
        fused_head_kernel,
        out_shape=jax.ShapeDtypeStruct((bs, 1), jnp.float32),
        in_specs=[vmem] * len(args),
        out_specs=vmem,
    )(*args)


# ------------------------------------------------------------------
# Parameter init (same shapes as the PyTorch module) + pure-JAX reference
# ------------------------------------------------------------------
def init_params(key):
    ks = jax.random.split(key, 8)

    def lin(k, fout, fin):
        bound = 1.0 / np.sqrt(fin)
        kw, kb = jax.random.split(k)
        wgt = jax.random.uniform(kw, (fout, fin), jnp.float32, -bound, bound)
        b = jax.random.uniform(kb, (fout,), jnp.float32, -bound, bound)
        return wgt, b

    w1, b1 = lin(ks[0], 1024, 2048)
    wm1, bm1 = lin(ks[1], 111, 11)
    wm2, bm2 = lin(ks[2], 11, 111)
    w0, b0 = lin(ks[3], 1, 1024 + 11)
    return {
        "w1": w1, "b1": b1,
        "wm1": wm1, "bm1": bm1, "g1": jnp.ones((111,), jnp.float32), "be1": jnp.zeros((111,), jnp.float32),
        "wm2": wm2, "bm2": bm2, "g2": jnp.ones((11,), jnp.float32), "be2": jnp.zeros((11,), jnp.float32),
        "w0": w0, "b0": b0,
    }


def reference_forward(feat, meta, p):
    # Unfused math, exactly mirroring the PyTorch module's forward.
    bs = feat.shape[0]
    x = jnp.mean(feat.reshape(bs, feat.shape[1], -1), axis=-1)
    x = x @ p["w1"].T + p["b1"]

    def bn(hh, g, b):
        mu = jnp.mean(hh, axis=0, keepdims=True)
        var = jnp.mean(jnp.square(hh - mu), axis=0, keepdims=True)
        return (hh - mu) / jnp.sqrt(var + BN_EPS) * g + b

    f = meta @ p["wm1"].T + p["bm1"]
    f = jnp.maximum(bn(f, p["g1"], p["be1"]), 0.0)
    f = f @ p["wm2"].T + p["bm2"]
    f = jnp.maximum(bn(f, p["g2"], p["be2"]), 0.0)
    out = jnp.concatenate([x, f], axis=1)
    return out @ p["w0"].T + p["b0"]


if __name__ == "__main__":
    key = jax.random.PRNGKey(0)
    k_feat, k_meta, k_par = jax.random.split(key, 3)

    bs = 2
    # TODO(synk): stand-in for self.model.features(x); the se_resnext50_32x4d backbone is
    # an external pretrained network and is not translated here.
    feat = jax.random.normal(k_feat, (bs, 2048, 2, 2), dtype=jnp.float32)
    meta = jax.random.normal(k_meta, (bs, 11), dtype=jnp.float32)
    params = init_params(k_par)

    out = res50_meta_forward(feat, meta, params)
    out = jax.block_until_ready(out)

    ref = reference_forward(feat, meta, params)
    assert out.shape == (bs, 1)
    # Tolerance allows for the (mathematically exact) reassociation introduced by folding
    # l1 into l0 on the x path; everything stays in f32.
    np.testing.assert_allclose(np.asarray(out), np.asarray(ref), rtol=1e-3, atol=1e-3)
    print("KERNEL_OK")
</pallas_src>

<mosaic_0001>
module attributes {stable_mosaic.version = 11 : i64} {
  func.func @fused_head_kernel(%arg0: memref<2x4x2048xf32, #tpu.memory_space<vmem>>, %arg1: memref<1x2048xf32, #tpu.memory_space<vmem>>, %arg2: memref<2x11xf32, #tpu.memory_space<vmem>>, %arg3: memref<11x111xf32, #tpu.memory_space<vmem>>, %arg4: memref<1x111xf32, #tpu.memory_space<vmem>>, %arg5: memref<1x111xf32, #tpu.memory_space<vmem>>, %arg6: memref<1x111xf32, #tpu.memory_space<vmem>>, %arg7: memref<111x11xf32, #tpu.memory_space<vmem>>, %arg8: memref<1x11xf32, #tpu.memory_space<vmem>>, %arg9: memref<1x11xf32, #tpu.memory_space<vmem>>, %arg10: memref<1x11xf32, #tpu.memory_space<vmem>>, %arg11: memref<1x11xf32, #tpu.memory_space<vmem>>, %arg12: memref<1x1xf32, #tpu.memory_space<vmem>>, %arg13: memref<2x1xf32, #tpu.memory_space<vmem>>) attributes {dimension_semantics = [], scalar_prefetch = 0 : i64, scratch_operands = 0 : i64, tpu.core_type = #tpu.core_type<tc>} {
    %c0 = arith.constant 0 : index
    %c0_0 = arith.constant 0 : index
    %c0_1 = arith.constant 0 : index
    %0 = vector.load %arg0[%c0, %c0_0, %c0_1] : memref<2x4x2048xf32, #tpu.memory_space<vmem>>, vector<2x4x2048xf32>
    %cst = arith.constant dense<0.000000e+00> : vector<2x2048xf32>
    %1 = vector.multi_reduction <add>, %0, %cst [1] : vector<2x4x2048xf32> to vector<2x2048xf32>
    %cst_2 = arith.constant 4.000000e+00 : f32
    %2 = vector.broadcast %cst_2 : f32 to vector<2x2048xf32>
    %3 = arith.divf %1, %2 : vector<2x2048xf32>
    %c0_3 = arith.constant 0 : index
    %c0_4 = arith.constant 0 : index
    %4 = vector.load %arg1[%c0_3, %c0_4] : memref<1x2048xf32, #tpu.memory_space<vmem>>, vector<1x2048xf32>
    %5 = vector.shape_cast %4 : vector<1x2048xf32> to vector<2048xf32>
    %6 = vector.shape_cast %5 : vector<2048xf32> to vector<1x2048xf32>
    %7 = vector.broadcast %6 : vector<1x2048xf32> to vector<2x2048xf32>
    %8 = arith.mulf %3, %7 : vector<2x2048xf32>
    %cst_5 = arith.constant dense<0.000000e+00> : vector<2xf32>
    %9 = vector.multi_reduction <add>, %8, %cst_5 [1] : vector<2x2048xf32> to vector<2xf32>
    %10 = vector.shape_cast %9 : vector<2xf32> to vector<2x1xf32>
    %c0_6 = arith.constant 0 : index
    %c0_7 = arith.constant 0 : index
    %11 = vector.load %arg2[%c0_6, %c0_7] : memref<2x11xf32, #tpu.memory_space<vmem>>, vector<2x11xf32>
    %c0_8 = arith.constant 0 : index
    %c0_9 = arith.constant 0 : index
    %12 = vector.load %arg3[%c0_8, %c0_9] : memref<11x111xf32, #tpu.memory_space<vmem>>, vector<11x111xf32>
    %cst_10 = arith.constant dense<0.000000e+00> : vector<2x111xf32>
    %13 = tpu.matmul %11, %12, %cst_10 {dimension_numbers = #tpu.dot_dimension_numbers<[1], [0], [0], [1], [0, 0, 1, 1], [], []>, precision = #tpu.contract_precision<fp32>} : vector<2x11xf32>, vector<11x111xf32>, vector<2x111xf32> -> vector<2x111xf32>
    %c0_11 = arith.constant 0 : index
    %c0_12 = arith.constant 0 : index
    %14 = vector.load %arg4[%c0_11, %c0_12] : memref<1x111xf32, #tpu.memory_space<vmem>>, vector<1x111xf32>
    %15 = vector.shape_cast %14 : vector<1x111xf32> to vector<111xf32>
    %16 = vector.shape_cast %15 : vector<111xf32> to vector<1x111xf32>
    %17 = vector.broadcast %16 : vector<1x111xf32> to vector<2x111xf32>
    %18 = arith.addf %13, %17 : vector<2x111xf32>
    %cst_13 = arith.constant dense<0.000000e+00> : vector<111xf32>
    %19 = vector.multi_reduction <add>, %18, %cst_13 [0] : vector<2x111xf32> to vector<111xf32>
    %20 = vector.shape_cast %19 : vector<111xf32> to vector<1x111xf32>
    %cst_14 = arith.constant 2.000000e+00 : f32
    %21 = vector.broadcast %cst_14 : f32 to vector<1x111xf32>
    %22 = arith.divf %20, %21 : vector<1x111xf32>
    %23 = vector.broadcast %22 : vector<1x111xf32> to vector<2x111xf32>
    %24 = arith.subf %18, %23 : vector<2x111xf32>
    %25 = arith.mulf %24, %24 : vector<2x111xf32>
    %cst_15 = arith.constant dense<0.000000e+00> : vector<111xf32>
    %26 = vector.multi_reduction <add>, %25, %cst_15 [0] : vector<2x111xf32> to vector<111xf32>
    %27 = vector.shape_cast %26 : vector<111xf32> to vector<1x111xf32>
    %cst_16 = arith.constant 2.000000e+00 : f32
    %28 = vector.broadcast %cst_16 : f32 to vector<1x111xf32>
    %29 = arith.divf %27, %28 : vector<1x111xf32>
    %30 = vector.broadcast %22 : vector<1x111xf32> to vector<2x111xf32>
    %31 = arith.subf %18, %30 : vector<2x111xf32>
    %cst_17 = arith.constant 9.99999974E-6 : f32
    %32 = vector.broadcast %cst_17 : f32 to vector<1x111xf32>
    %33 = arith.addf %29, %32 : vector<1x111xf32>
    %34 = math.rsqrt %33 : vector<1x111xf32>
    %35 = vector.broadcast %34 : vector<1x111xf32> to vector<2x111xf32>
    %36 = arith.mulf %31, %35 : vector<2x111xf32>
    %c0_18 = arith.constant 0 : index
    %c0_19 = arith.constant 0 : index
    %37 = vector.load %arg5[%c0_18, %c0_19] : memref<1x111xf32, #tpu.memory_space<vmem>>, vector<1x111xf32>
    %38 = vector.shape_cast %37 : vector<1x111xf32> to vector<111xf32>
    %39 = vector.shape_cast %38 : vector<111xf32> to vector<1x111xf32>
    %40 = vector.broadcast %39 : vector<1x111xf32> to vector<2x111xf32>
    %41 = arith.mulf %36, %40 : vector<2x111xf32>
    %c0_20 = arith.constant 0 : index
    %c0_21 = arith.constant 0 : index
    %42 = vector.load %arg6[%c0_20, %c0_21] : memref<1x111xf32, #tpu.memory_space<vmem>>, vector<1x111xf32>
    %43 = vector.shape_cast %42 : vector<1x111xf32> to vector<111xf32>
    %44 = vector.shape_cast %43 : vector<111xf32> to vector<1x111xf32>
    %45 = vector.broadcast %44 : vector<1x111xf32> to vector<2x111xf32>
    %46 = arith.addf %41, %45 : vector<2x111xf32>
    %cst_22 = arith.constant 0.000000e+00 : f32
    %47 = vector.broadcast %cst_22 : f32 to vector<2x111xf32>
    %48 = arith.maximumf %46, %47 : vector<2x111xf32>
    %c0_23 = arith.constant 0 : index
    %c0_24 = arith.constant 0 : index
    %49 = vector.load %arg7[%c0_23, %c0_24] : memref<111x11xf32, #tpu.memory_space<vmem>>, vector<111x11xf32>
    %cst_25 = arith.constant dense<0.000000e+00> : vector<2x11xf32>
    %50 = tpu.matmul %48, %49, %cst_25 {dimension_numbers = #tpu.dot_dimension_numbers<[1], [0], [0], [1], [0, 0, 1, 1], [], []>, precision = #tpu.contract_precision<fp32>} : vector<2x111xf32>, vector<111x11xf32>, vector<2x11xf32> -> vector<2x11xf32>
    %c0_26 = arith.constant 0 : index
    %c0_27 = arith.constant 0 : index
    %51 = vector.load %arg8[%c0_26, %c0_27] : memref<1x11xf32, #tpu.memory_space<vmem>>, vector<1x11xf32>
    %52 = vector.shape_cast %51 : vector<1x11xf32> to vector<11xf32>
    %53 = vector.shape_cast %52 : vector<11xf32> to vector<1x11xf32>
    %54 = vector.broadcast %53 : vector<1x11xf32> to vector<2x11xf32>
    %55 = arith.addf %50, %54 : vector<2x11xf32>
    %cst_28 = arith.constant dense<0.000000e+00> : vector<11xf32>
    %56 = vector.multi_reduction <add>, %55, %cst_28 [0] : vector<2x11xf32> to vector<11xf32>
    %57 = vector.shape_cast %56 : vector<11xf32> to vector<1x11xf32>
    %cst_29 = arith.constant 2.000000e+00 : f32
    %58 = vector.broadcast %cst_29 : f32 to vector<1x11xf32>
    %59 = arith.divf %57, %58 : vector<1x11xf32>
    %60 = vector.broadcast %59 : vector<1x11xf32> to vector<2x11xf32>
    %61 = arith.subf %55, %60 : vector<2x11xf32>
    %62 = arith.mulf %61, %61 : vector<2x11xf32>
    %cst_30 = arith.constant dense<0.000000e+00> : vector<11xf32>
    %63 = vector.multi_reduction <add>, %62, %cst_30 [0] : vector<2x11xf32> to vector<11xf32>
    %64 = vector.shape_cast %63 : vector<11xf32> to vector<1x11xf32>
    %cst_31 = arith.constant 2.000000e+00 : f32
    %65 = vector.broadcast %cst_31 : f32 to vector<1x11xf32>
    %66 = arith.divf %64, %65 : vector<1x11xf32>
    %67 = vector.broadcast %59 : vector<1x11xf32> to vector<2x11xf32>
    %68 = arith.subf %55, %67 : vector<2x11xf32>
    %cst_32 = arith.constant 9.99999974E-6 : f32
    %69 = vector.broadcast %cst_32 : f32 to vector<1x11xf32>
    %70 = arith.addf %66, %69 : vector<1x11xf32>
    %71 = math.rsqrt %70 : vector<1x11xf32>
    %72 = vector.broadcast %71 : vector<1x11xf32> to vector<2x11xf32>
    %73 = arith.mulf %68, %72 : vector<2x11xf32>
    %c0_33 = arith.constant 0 : index
    %c0_34 = arith.constant 0 : index
    %74 = vector.load %arg9[%c0_33, %c0_34] : memref<1x11xf32, #tpu.memory_space<vmem>>, vector<1x11xf32>
    %75 = vector.shape_cast %74 : vector<1x11xf32> to vector<11xf32>
    %76 = vector.shape_cast %75 : vector<11xf32> to vector<1x11xf32>
    %77 = vector.broadcast %76 : vector<1x11xf32> to vector<2x11xf32>
    %78 = arith.mulf %73, %77 : vector<2x11xf32>
    %c0_35 = arith.constant 0 : index
    %c0_36 = arith.constant 0 : index
    %79 = vector.load %arg10[%c0_35, %c0_36] : memref<1x11xf32, #tpu.memory_space<vmem>>, vector<1x11xf32>
    %80 = vector.shape_cast %79 : vector<1x11xf32> to vector<11xf32>
    %81 = vector.shape_cast %80 : vector<11xf32> to vector<1x11xf32>
    %82 = vector.broadcast %81 : vector<1x11xf32> to vector<2x11xf32>
    %83 = arith.addf %78, %82 : vector<2x11xf32>
    %cst_37 = arith.constant 0.000000e+00 : f32
    %84 = vector.broadcast %cst_37 : f32 to vector<2x11xf32>
    %85 = arith.maximumf %83, %84 : vector<2x11xf32>
    %c0_38 = arith.constant 0 : index
    %c0_39 = arith.constant 0 : index
    %86 = vector.load %arg11[%c0_38, %c0_39] : memref<1x11xf32, #tpu.memory_space<vmem>>, vector<1x11xf32>
    %87 = vector.shape_cast %86 : vector<1x11xf32> to vector<11xf32>
    %88 = vector.shape_cast %87 : vector<11xf32> to vector<1x11xf32>
    %89 = vector.broadcast %88 : vector<1x11xf32> to vector<2x11xf32>
    %90 = arith.mulf %85, %89 : vector<2x11xf32>
    %cst_40 = arith.constant dense<0.000000e+00> : vector<2xf32>
    %91 = vector.multi_reduction <add>, %90, %cst_40 [1] : vector<2x11xf32> to vector<2xf32>
    %92 = vector.shape_cast %91 : vector<2xf32> to vector<2x1xf32>
    %93 = arith.addf %10, %92 : vector<2x1xf32>
    %c0_41 = arith.constant 0 : index
    %c0_42 = arith.constant 0 : index
    %94 = vector.load %arg12[%c0_41, %c0_42] : memref<1x1xf32, #tpu.memory_space<vmem>>, vector<1x1xf32>
    %95 = vector.broadcast %94 : vector<1x1xf32> to vector<2x1xf32>
    %96 = arith.addf %93, %95 : vector<2x1xf32>
    %c0_43 = arith.constant 0 : index
    %c0_44 = arith.constant 0 : index
    %97 = vector.load %arg13[%c0_43, %c0_44] : memref<2x1xf32, #tpu.memory_space<vmem>>, vector<2x1xf32>
    tpu.vector_store %arg13[%c0_43, %c0_44], %96 {strides = array<i32>} : memref<2x1xf32, #tpu.memory_space<vmem>>, vector<2x1xf32>,
    return
  }
}

</mosaic_0001>

<bundles_post_ra>
// kernel: tpu_custom_call.1
= control target key start
LH: loop header
LB: loop body
LE: loop exit
PB: predicated region body
PF: predicated region fallthrough
CT: control target
= control target key end

     0   :  { %s3113_s0 = inlined_call_operand.vmem [shape: f32[2,4,2048], index: 0, kind: input, shape index: {}]   ;;  %s3114_s1 = inlined_call_operand.hbm [shape: f32[1,2048], index: 1, kind: input, shape index: {}]   ;;  %s3115_s2 = inlined_call_operand.vmem [shape: f32[2,11], index: 2, kind: input, shape index: {}]   ;;  %s3116_s3 = inlined_call_operand.hbm [shape: f32[11,111], index: 3, kind: input, shape index: {}]   ;;  %s3117_s4 = inlined_call_operand.vmem [shape: f32[1,111], index: 4, kind: input, shape index: {}]   ;;  %s3118_s5 = inlined_call_operand.vmem [shape: f32[1,111], index: 5, kind: input, shape index: {}]   ;;  %s3119_s6 = inlined_call_operand.vmem [shape: f32[1,111], index: 6, kind: input, shape index: {}]   ;;  %s3120_s7 = inlined_call_operand.vmem [shape: f32[111,11], index: 7, kind: input, shape index: {}]   ;;  %s3121_s8 = inlined_call_operand.vmem [shape: f32[1,11], index: 8, kind: input, shape index: {}]   ;;  %s3122_s9 = inlined_call_operand.vmem [shape: f32[1,11], index: 9, kind: input, shape index: {}]   ;;  %s3123_s10 = inlined_call_operand.vmem [shape: f32[1,11], index: 10, kind: input, shape index: {}]   ;;  %s3124_s11 = inlined_call_operand.vmem [shape: f32[1,11], index: 11, kind: input, shape index: {}]   ;;  %s3125_s12 = inlined_call_operand.<no memory space> [shape: f32[1,1], index: 12, kind: input, shape index: {}]   ;;  %s3126_s13 = inlined_call_operand.vmem [shape: f32[2,1], index: 13, kind: output, shape index: {}]  }
   0x1   :  { %v18_v0 = vstv %s3125_s12 }
   0x2   :  { %19 = vst [vmem:[#allocation2] sm:$0x1] %v18_v0 }
   0x3   :  { %20 = vsyncpa [#allocation4], 0 }
   0x4   :  { %21 = vsyncpa [#allocation6], 0  ;;  %s2267_s27 = smov [#allocation3]   ;;  %s2268_s29 = smov [#allocation5]  }
   0x5   :  { %s30_s28 = sshll.u32 %s2267_s27, 4  ;;  %s41_s30 = sshll.u32 %s2268_s29, 4  ;;  %s31_s28 = int_to_ptr.vmem [resolvable:$true] %s30_s28  ;;  %s42_s30 = int_to_ptr.vmem [resolvable:$true] %s41_s30 }
   0x6   :  { %s2231_s14 = scalar_lea.vmem %s31_s28, 256  ;;  %p2236_p1 = scmp.lt.s32.totalorder %s31_s28, %s31_s28 }
   0x7   :  { %p2232_p0 = scmp.ne.s32.totalorder %s31_s28, %s2231_s14  ;;  %p2237_p2 = scmp.lt.s32.totalorder %s2231_s14, %s2231_s14 }
   0x9   :  { %p2238_p3 = por %p2237_p2, %p2236_p1 }
   0xb   :  { %p2239_p4 = pnand %p2238_p3, %p2232_p0 }
   0xd   :  { %2242 = shalt.err (!%p2239_p4)
}
   0xe   :  { %33 = dma.hbm_to_vmem [thread:$0]  %s3114_s1, 256, %s31_s28, [#allocation4]  }
   0xf   :  { %s2251_s12 = scalar_lea.vmem %s42_s30, 256  ;;  %p2256_p6 = scmp.lt.s32.totalorder %s42_s30, %s42_s30 }
  0x10   :  { %p2252_p5 = scmp.ne.s32.totalorder %s42_s30, %s2251_s12  ;;  %p2257_p7 = scmp.lt.s32.totalorder %s2251_s12, %s2251_s12 }
  0x12   :  { %p2258_p8 = por %p2257_p7, %p2256_p6 }
  0x14   :  { %p2259_p9 = pnand %p2258_p8, %p2252_p5 }
  0x16   :  { %2262 = shalt.err (!%p2259_p9)
}
  0x17   :  { %s2269_s17 = smov 128   ;;  %s2270_s18 = smov 8  }
  0x18   :  { %47 = dma.hbm_to_vmem [thread:$0]  %s3116_s3, 256, %s42_s30, [#allocation6], %s2269_s17, %s2269_s17, %s2270_s18  }
  0x19   :  { %2263 = dma.done.wait [#allocation4], 256  }
  0x1a   :  { %2264 = vsyncadd [#allocation4], 4294967040 }
  0x1b   :  { %2265 = dma.done.wait [#allocation6], 256  }
  0x1c   :  { %2266 = vsyncadd [#allocation6], 4294967040  ;;  %v2271_v1 = vmov 0.0   ;;  %vm2272_vm0 = vmmov 0   ;;  %vm639_vm1 = vcmask 1042432   ;;  %vm635_vm2 = vcmask 89088  }
  0x1d   :  { %1969 = vmatprep.subr.mxu0 %v2271_v1  ;;  %1973 = vmatprep.mubr.msk.f32.mxu0 %vm2272_vm0, %v2271_v1  ;;  %v627_v2 = vld [vmem:[#allocation5 + $0x8] sm:$0x7]  ;;  %v626_v3 = vld [vmem:[#allocation5] sm:$0xff]  ;;  %v625_v4 = vld [vmem:[%s3115_s2] sm:$0x3]  ;;  %vm1167_vm3 = vcmask 1046528  }
  0x1e   :  { %1976 = vmatprep.subr.mxu1 %v2271_v1  ;;  %1980 = vmatprep.mubr.msk.f32.mxu1 %vm2272_vm0, %v2271_v1  ;;  %v641_v5 = vsel %vm639_vm1, %v627_v2, 0  ;;  %v675_v6 = vand.u32 4294901760, %v626_v3  ;;  %v637_v7 = vsel %vm635_vm2, %v625_v4, 0  ;;  %v1155_v22 = vld [vmem:[%s3120_s7 + $0x68] sm:$0x7f]  ;;  %v1154_v25 = vld [vmem:[%s3120_s7 + $0x60] sm:$0xff] }
  0x1f   :  { %v672_v8 = vand.u32 4294901760, %v641_v5  ;;  %v710_v9 = vand.u32 4294901760, %v637_v7  ;;  %v1169_v23 = vsel %vm1167_vm3, %v1155_v22, 0  ;;  %v2396_v27 = vand.u32 4294901760, %v1154_v25  ;;  %v1153_v28 = vld [vmem:[%s3120_s7 + $0x58] sm:$0xff]  ;;  %v1152_v32 = vld [vmem:[%s3120_s7 + $0x50] sm:$0xff] }
  0x20   :  { %v757_v10 = vsub.f32 %v626_v3, %v675_v6  ;;  %v2388_v24 = vand.u32 4294901760, %v1169_v23  ;;  %v2407_v31 = vand.u32 4294901760, %v1153_v28  ;;  %v2421_v36 = vand.u32 4294901760, %v1152_v32  ;;  %v1151_v37 = vld [vmem:[%s3120_s7 + $0x48] sm:$0xff]  ;;  %v1150_v43 = vld [vmem:[%s3120_s7 + $0x40] sm:$0xff]  ;;  %v1149_v49 = vld [vmem:[%s3120_s7 + $0x38] sm:$0xff] }
  0x21   :  { %1970 = vmatpush3.msra.mxu0 %v672_v8  ;;  %v711_v11 = vsub.f32 %v637_v7, %v710_v9  ;;  %v750_v12 = vsub.f32 %v641_v5, %v672_v8  ;;  %v2405_v30 = vsub.f32 %v1154_v25, %v2396_v27  ;;  %v2436_v42 = vand.u32 4294901760, %v1151_v37  ;;  %v1148_v55 = vld [vmem:[%s3120_s7 + $0x30] sm:$0xff]  ;;  %v1147_v61 = vld [vmem:[%s3120_s7 + $0x28] sm:$0xff]  ;;  %v1146_v4 = vld [vmem:[%s3120_s7 + $0x20] sm:$0xff] }
  0x22   :  { %1971 = vmatprep.subr.mxu0 %v2271_v1  ;;  %v758_v13 = vand.u32 4294901760, %v757_v10  ;;  %v2394_v26 = vsub.f32 %v1169_v23, %v2388_v24  ;;  %v2419_v35 = vsub.f32 %v1153_v28, %v2407_v31  ;;  %v2433_v41 = vsub.f32 %v1152_v32, %v2421_v36  ;;  %v1143_v22 = vld [vmem:[%s3120_s7 + $0x8] sm:$0xff] }
  0x23   :  { %1972 = vmatpush3.msra.mxu0 %v675_v6  ;;  %v712_v14 = vand.u32 4294901760, %v711_v11  ;;  %v751_v15 = vand.u32 4294901760, %v750_v12  ;;  %v1274_v34 = vand.u32 4294901760, %v2405_v30  ;;  %v2446_v47 = vand.u32 4294901760, %v1150_v43 }
  0x24   :  { %1983 = vmatprep.subr.mxu0 %v2271_v1  ;;  %v759_v16 = vsub.f32 %v757_v10, %v758_v13  ;;  %v1267_v29 = vand.u32 4294901760, %v2394_v26  ;;  %v1281_v40 = vand.u32 4294901760, %v2419_v35  ;;  %v1288_v46 = vand.u32 4294901760, %v2433_v41 }
  0x25   :  { %v713_v17 = vsub.f32 %v711_v11, %v712_v14  ;;  %v752_v18 = vsub.f32 %v750_v12, %v751_v15  ;;  %v1275_v39 = vsub.f32 %v2405_v30, %v1274_v34  ;;  %v2450_v48 = vsub.f32 %v1151_v37, %v2436_v42  ;;  %v1142_v37 = vld [vmem:[%s3120_s7] sm:$0xff] }
  0x26   :  { %v760_v21 = vand.u32 4294901760, %v759_v16  ;;  %v1268_v33 = vsub.f32 %v2394_v26, %v1267_v29  ;;  %v1282_v45 = vsub.f32 %v2419_v35, %v1281_v40  ;;  %v1289_v51 = vsub.f32 %v2433_v41, %v1288_v46  ;;  %v1144_v16 = vld [vmem:[%s3120_s7 + $0x10] sm:$0xff] }
  0x27   :  { %v714_v19 = vand.u32 4294901760, %v713_v17  ;;  %v753_v20 = vand.u32 4294901760, %v752_v18  ;;  %v1276_v44 = vand.u32 4294901760, %v1275_v39  ;;  %v2460_v52 = vsub.f32 %v1150_v43, %v2446_v47 }
  0x28   :  { %v1269_v38 = vand.u32 4294901760, %v1268_v33  ;;  %v1283_v50 = vand.u32 4294901760, %v1282_v45  ;;  %v2462_v53 = vand.u32 4294901760, %v1149_v49  ;;  %v1295_v54 = vand.u32 4294901760, %v2450_v48 }
  0x29   :  { %1974 = vmatmul.mubr.f32.vlgmr.msra.gmra.mxu0 %v714_v19  ;;  %1977 = vmatpush3.msra.mxu1 %v753_v20  ;;  %v1290_v56 = vand.u32 4294901760, %v1289_v51  ;;  %v1302_v57 = vand.u32 4294901760, %v2460_v52  ;;  %v2475_v59 = vand.u32 4294901760, %v1148_v55  ;;  %v2493_v2 = vand.u32 4294901760, %v1147_v61 }
  0x2a   :  { %1978 = vmatprep.subr.mxu1 %v2271_v1  ;;  %1984 = vmatpush3.msra.mxu0 %v750_v12  ;;  %v2473_v58 = vsub.f32 %v1149_v49, %v2462_v53  ;;  %v1296_v60 = vsub.f32 %v2450_v48, %v1295_v54  ;;  %v2537_v20 = vand.u32 4294901760, %v1144_v16  ;;  %v2550_v32 = vand.u32 4294901760, %v1143_v22 }
  0x2b   :  { %1979 = vmatpush3.msra.mxu1 %v760_v21  ;;  %1985 = vmatprep.subr.mxu0 %v2271_v1  ;;  %v1303_v62 = vsub.f32 %v2460_v52, %v1302_v57  ;;  %v2491_v0 = vsub.f32 %v1148_v55, %v2475_v59  ;;  %vm1102_vm4 = vcmask 902144   ;;  %vm1163_vm5 = vcmask 908288  }
  0x2c   :  { %1981 = vmatmul.mubr.f32.vlgmr.msra.gmra.mxu1 %v710_v9  ;;  %1986 = vmatpush3.msra.mxu0 %v757_v10  ;;  %v1309_v63 = vand.u32 4294901760, %v2473_v58  ;;  %v1297_v3 = vand.u32 4294901760, %v1296_v60  ;;  %v1145_v10 = vld [vmem:[%s3120_s7 + $0x18] sm:$0xff]  ;;  %v2548_v28 = vsub.f32 %v1144_v16, %v2537_v20  ;;  %v2566_v43 = vsub.f32 %v1143_v22, %v2550_v32 }
  0x2d   :  { %1987 = vmatprep.mubr.msk.f32.mxu0 %vm2272_vm0, %v2271_v1  ;;  %1990 = vmatprep.subr.mxu1 %v2271_v1  ;;  %v1304_v5 = vand.u32 4294901760, %v1303_v62  ;;  %v1316_v7 = vand.u32 4294901760, %v2491_v0  ;;  %vm136_vm6 = vcmask 1043456   ;;  %vm543_vm7 = vcmask 1041409  }
  0x2e   :  { %1988 = vmatmul.mubr.f32.vlgmr.msra.gmra.mxu0 %v711_v11  ;;  %1991 = vmatpush3.msra.mxu1 %v672_v8  ;;  %v1344_v39 = vand.u32 4294901760, %v2548_v28  ;;  %v1351_v51 = vand.u32 4294901760, %v2566_v43  ;;  %vm591_vm8 = vcmask 1041408   ;;  %vm1786_vm9 = vcmask 82944  }
  0x2f   :  { %1997 = vmatprep.subr.mxu0 %v2271_v1  ;;  %1992 = vmatprep.subr.mxu1 %v2271_v1  ;;  %v1317_v12 = vsub.f32 %v2491_v0, %v1316_v7  ;;  %vm1845_vm10 = vcmask 1024  }
  0x30   :  { %1998 = vmatpush3.msra.mxu0 %v751_v15  ;;  %1993 = vmatpush3.msra.mxu1 %v675_v6  ;;  %v1352_v60 = vsub.f32 %v2566_v43, %v1351_v51 }
  0x31   :  { %1994 = vmatprep.mubr.msk.f32.mxu1 %vm2272_vm0, %v2271_v1  ;;  %1999 = vmatprep.subr.mxu0 %v2271_v1  ;;  %v1318_v17 = vand.u32 4294901760, %v1317_v12 }
  0x32   :  { %1995 = vmatmul.mubr.f32.vlgmr.msra.gmra.mxu1 %v712_v14  ;;  %2000 = vmatpush3.msra.mxu0 %v758_v13  ;;  %v2520_v14 = vand.u32 4294901760, %v1145_v10  ;;  %v1353_v62 = vand.u32 4294901760, %v1352_v60 }
  0x33   :  { %2001 = vmatprep.mubr.msk.f32.mxu0 %vm2272_vm0, %v2271_v1  ;;  %2004 = vmatprep.subr.mxu1 %v2271_v1 }
  0x34   :  { %2002 = vmatmul.mubr.f32.vlgmr.msra.gmra.mxu0 %v710_v9  ;;  %2005 = vmatpush3.msra.mxu1 %v672_v8  ;;  %v2506_v8 = vsub.f32 %v1147_v61, %v2493_v2  ;;  %v2535_v19 = vsub.f32 %v1145_v10, %v2520_v14 }
  0x35   :  { %2006 = vmatprep.subr.mxu1 %v2271_v1  ;;  %2008 = vmatprep.mubr.msk.f32.mxu1 %vm2272_vm0, %v2271_v1 }
  0x36   :  { %2007 = vmatpush3.msra.mxu1 %v675_v6  ;;  %2011 = vmatprep.subr.mxu0 %v2271_v1  ;;  %v1310_v6 = vsub.f32 %v2473_v58, %v1309_v63  ;;  %v1323_v13 = vand.u32 4294901760, %v2506_v8  ;;  %v1337_v25 = vand.u32 4294901760, %v2535_v19 }
  0x37   :  { %2009 = vmatmul.mubr.f32.vlgmr.msra.gmra.mxu1 %v710_v9  ;;  %2042 = vmatprep.subr.mxu1 %v2271_v1  ;;  %v2509_v9 = vand.u32 4294901760, %v1146_v4 }
  0x38   :  { %2070 = vmatprep.mubr.msk.f32.mxu1 %vm2272_vm0, %v2271_v1  ;;  %2039 = vmatprep.mubr.msk.f32.mxu0 %vm2272_vm0, %v2271_v1  ;;  %v1311_v11 = vand.u32 4294901760, %v1310_v6  ;;  %v1324_v18 = vsub.f32 %v2506_v8, %v1323_v13 }
  0x39   :  { %2012 = vmatpush3.msra.mxu0 %v2388_v24  ;;  %2043 = vmatpush3.msra.mxu1 %v1269_v38  ;;  %v2524_v15 = vsub.f32 %v1146_v4, %v2509_v9  ;;  %v1338_v38 = vsub.f32 %v2535_v19, %v1337_v25 }
  0x3a   :  { %2013 = vmatprep.subr.mxu0 %v2271_v1  ;;  %2044 = vmatprep.subr.mxu1 %v2271_v1  ;;  %v1325_v23 = vand.u32 4294901760, %v1324_v18 }
  0x3b   :  { %2014 = vmatpush3.msra.mxu0 %v2396_v27  ;;  %2045 = vmatpush3.msra.mxu1 %v1276_v44  ;;  %v1330_v21 = vand.u32 4294901760, %v2524_v15  ;;  %v2568_v44 = vand.u32 4294901760, %v1142_v37  ;;  %v1339_v49 = vand.u32 4294901760, %v1338_v38 }
  0x3c   :  { %2015 = vmatprep.subr.mxu0 %v2271_v1  ;;  %2046 = vmatprep.subr.mxu1 %v2271_v1 }
  0x3d   :  { %2016 = vmatpush3.msra.mxu0 %v2407_v31  ;;  %2047 = vmatpush3.msra.mxu1 %v1283_v50  ;;  %v1331_v33 = vsub.f32 %v2524_v15, %v1330_v21  ;;  %v1345_v50 = vsub.f32 %v2548_v28, %v1344_v39  ;;  %v2578_v55 = vsub.f32 %v1142_v37, %v2568_v44 }
  0x3e   :  { %2017 = vmatprep.subr.mxu0 %v2271_v1  ;;  %2048 = vmatprep.subr.mxu1 %v2271_v1 }
  0x3f   :  { %2018 = vmatpush3.msra.mxu0 %v2421_v36  ;;  %2049 = vmatpush3.msra.mxu1 %v1290_v56  ;;  %v1332_v45 = vand.u32 4294901760, %v1331_v33  ;;  %v1346_v56 = vand.u32 4294901760, %v1345_v50  ;;  %v3127_v61 = vand.u32 4294901760, %v2578_v55 }
  0x40   :  { %2019 = vmatprep.subr.mxu0 %v2271_v1  ;;  %2050 = vmatprep.subr.mxu1 %v2271_v1 }
  0x41   :  { %2020 = vmatpush3.msra.mxu0 %v2436_v42  ;;  %2051 = vmatpush3.msra.mxu1 %v1297_v3  ;;  %v1359_v3 = vsub.f32 %v2578_v55, %v3127_v61 }
  0x42   :  { %2021 = vmatprep.subr.mxu0 %v2271_v1  ;;  %2052 = vmatprep.subr.mxu1 %v2271_v1 }
  0x43   :  { %2022 = vmatpush3.msra.mxu0 %v2446_v47  ;;  %2053 = vmatpush3.msra.mxu1 %v1304_v5  ;;  %v1360_v4 = vand.u32 4294901760, %v1359_v3  ;;  %v1853_v5 = vld [vmem:[%s3117_s4] ss:$0 sm:$0xff] }
  0x44   :  { %2023 = vmatprep.subr.mxu0 %v2271_v1  ;;  %2054 = vmatprep.subr.mxu1 %v2271_v1 }
  0x45   :  { %2024 = vmatpush3.msra.mxu0 %v2462_v53  ;;  %2055 = vmatpush3.msra.mxu1 %v1311_v11 }
  0x46   :  { %2025 = vmatprep.subr.mxu0 %v2271_v1  ;;  %2056 = vmatprep.subr.mxu1 %v2271_v1 }
  0x47   :  { %2026 = vmatpush3.msra.mxu0 %v2475_v59  ;;  %2057 = vmatpush3.msra.mxu1 %v1318_v17 }
  0x48   :  { %2027 = vmatprep.subr.mxu0 %v2271_v1  ;;  %2058 = vmatprep.subr.mxu1 %v2271_v1 }
  0x49   :  { %2028 = vmatpush3.msra.mxu0 %v2493_v2  ;;  %2059 = vmatpush3.msra.mxu1 %v1325_v23 }
  0x4a   :  { %2029 = vmatprep.subr.mxu0 %v2271_v1  ;;  %2060 = vmatprep.subr.mxu1 %v2271_v1 }
  0x4b   :  { %2030 = vmatpush3.msra.mxu0 %v2509_v9  ;;  %2061 = vmatpush3.msra.mxu1 %v1332_v45 }
  0x4c   :  { %2031 = vmatprep.subr.mxu0 %v2271_v1  ;;  %2062 = vmatprep.subr.mxu1 %v2271_v1 }
  0x4d   :  { %2032 = vmatpush3.msra.mxu0 %v2520_v14  ;;  %2063 = vmatpush3.msra.mxu1 %v1339_v49 }
  0x4e   :  { %2033 = vmatprep.subr.mxu0 %v2271_v1  ;;  %2064 = vmatprep.subr.mxu1 %v2271_v1 }
  0x4f   :  { %2034 = vmatpush3.msra.mxu0 %v2537_v20  ;;  %2065 = vmatpush3.msra.mxu1 %v1346_v56 }
  0x50   :  { %2035 = vmatprep.subr.mxu0 %v2271_v1  ;;  %2066 = vmatprep.subr.mxu1 %v2271_v1 }
  0x51   :  { %2036 = vmatpush3.msra.mxu0 %v2550_v32  ;;  %2067 = vmatpush3.msra.mxu1 %v1353_v62 }
  0x52   :  { %2037 = vmatprep.subr.mxu0 %v2271_v1  ;;  %2068 = vmatprep.subr.mxu1 %v2271_v1 }
  0x53   :  { %2038 = vmatpush3.msra.mxu0 %v2568_v44  ;;  %2069 = vmatpush3.msra.mxu1 %v1360_v4 }
  0x54   :  { %2073 = vmatprep.subr.mxu0 %v2271_v1  ;;  %2104 = vmatprep.subr.mxu1 %v2271_v1 }
  0xe9   :  { %v716_v6 = vpop.f32.mrf.mxu0 }
  0xea   :  { %v717_v10 = vadd.f32 %v1853_v5, %v716_v6 }
  0xeb   :  { %v1975_v11 = vpop.f32.mrf.mxu0 }
  0xec   :  { %v797_v12 = vpop.f32.mrf.mxu1 }
  0xed   :  { %v798_v16 = vadd.f32 %v797_v12, %v717_v10 }
  0xee   :  { %v873_v17 = vpop.f32.mrf.mxu0  ;;  %v1982_v18 = vpop.f32.mrf.mxu1 }
  0xef   :  { %v874_v22 = vadd.f32 %v873_v17, %v798_v16 }
  0xf0   :  { %v1989_v23 = vpop.f32.mrf.mxu0 }
  0xf2   :  { %v948_v33 = vpop.f32.mrf.mxu1 }
  0xf3   :  { %v949_v37 = vadd.f32 %v948_v33, %v874_v22 }
  0xf4   :  { %v1025_v38 = vpop.f32.mrf.mxu0  ;;  %v1996_v45 = vpop.f32.mrf.mxu1 }
  0xf5   :  { %v1026_v49 = vadd.f32 %v1025_v38, %v949_v37 }
  0xf6   :  { %v2003_v50 = vpop.f32.mrf.mxu0 }
  0xf7   :  { %v1098_v56 = vpop.f32.mrf.mxu1 }
  0xf8   :  { %v1099_v60 = vadd.f32 %v1098_v56, %v1026_v49 }
  0xf9   :  { %v2010_v62 = vpop.f32.mrf.mxu1 }
  0xfa   :  { %v1103_v3 = vsel %vm1102_vm4, %v1099_v60, 0.0  ;;  %v1854_v62 = vld [vmem:[%s3118_s5] ss:$0 sm:$0xff] }
  0xfb   :  { %v1104_v4 = vrot.slane %v1103_v3, 4 }
  0xfd   :  { %v1105_v5 = vadd.f32 %v1104_v4, %v1103_v3 }
  0xff   :  { %v1106_v6 = vrot.slane %v1105_v5, 2 }
 0x101   :  { %v1107_v11 = vadd.f32 %v1106_v6, %v1105_v5 }
 0x103   :  { %v1108_v10 = vrot.slane %v1107_v11, 1 }
 0x105   :  { %v1109_v12 = vadd.f32 %v1108_v10, %v1107_v11 }
 0x107   :  { %v1111_v18 = vmul.f32 0.5, %v1109_v12 }
 0x109   :  { %v1112_v16 = vsub.f32 %v1099_v60, %v1111_v18  ;;  %v1855_v60 = vld [vmem:[%s3119_s6] ss:$0 sm:$0xff] }
 0x10b   :  { %v1113_v17 = vmul.f32 %v1112_v16, %v1112_v16 }
 0x10d   :  { %v1114_v23 = vsel %vm1102_vm4, %v1113_v17, 0.0 }
 0x10e   :  { %v1115_v22 = vrot.slane %v1114_v23, 4 }
 0x110   :  { %v1116_v33 = vadd.f32 %v1115_v22, %v1114_v23 }
 0x112   :  { %v1117_v45 = vrot.slane %v1116_v33, 2 }
 0x114   :  { %v1118_v37 = vadd.f32 %v1117_v45, %v1116_v33  ;;  %v2828_v33 = vld [vmem:[%s3113_s0 + $0x70] sm:$0xff] }
 0x116   :  { %v1119_v38 = vrot.slane %v1118_v37, 1 }
 0x118   :  { %v1120_v50 = vadd.f32 %v1119_v38, %v1118_v37 }
 0x11a   :  { %v1121_v61 = vmul.f32 0.5, %v1120_v50 }
 0x11c   :  { %v1122_v49 = vadd.f32 1e-05, %v1121_v61 }
 0x11e   :  { %2219 = vrsqrt.f32 %v1122_v49 }
 0x12b   :  { %v2220_v56 = vpop.eup %2219 }
 0x12c   :  { %v1124_v3 = vmul.f32 %v2220_v56, %v1112_v16 }
 0x12e   :  { %v1132_v4 = vmul.f32 %v1854_v62, %v1124_v3 }
 0x130   :  { %v1140_v5 = vadd.f32 %v1855_v60, %v1132_v4 }
 0x132   :  { %v1141_v6 = vmax.f32 %v1140_v5, 0.0 }
 0x134   :  { %v1165_v11 = vsel %vm1163_vm5, %v1141_v6, 0 }
 0x135   :  { %v2604_v10 = vand.u32 4294901760, %v1165_v11 }
 0x137   :  { %v2607_v61 = vsub.f32 %v1165_v11, %v2604_v10  ;;  %2071 = vmatmul.mubr.f32.vlgmr.msra.gmra.mxu1 %v2604_v10  ;;  %v118_v11 = vcombine.high %v2828_v33, %v2828_v33 }
 0x138   :  { %2105 = vmatpush3.msra.mxu1 %v2388_v24  ;;  %2132 = vmatprep.mubr.msk.f32.mxu1 %vm2272_vm0, %v2271_v1 }
 0x139   :  { %2106 = vmatprep.subr.mxu1 %v2271_v1  ;;  %v1252_v12 = vand.u32 4294901760, %v2607_v61 }
 0x13a   :  { %2107 = vmatpush3.msra.mxu1 %v2396_v27 }
 0x13b   :  { %2108 = vmatprep.subr.mxu1 %v2271_v1  ;;  %v1253_v18 = vsub.f32 %v2607_v61, %v1252_v12 }
 0x13c   :  { %2109 = vmatpush3.msra.mxu1 %v2407_v31 }
 0x13d   :  { %2110 = vmatprep.subr.mxu1 %v2271_v1  ;;  %v1254_v16 = vand.u32 4294901760, %v1253_v18 }
 0x13e   :  { %2111 = vmatpush3.msra.mxu1 %v2421_v36 }
 0x13f   :  { %2112 = vmatprep.subr.mxu1 %v2271_v1  ;;  %2040 = vmatmul.mubr.f32.vlgmr.msra.gmra.mxu0 %v1254_v16 }
 0x140   :  { %2074 = vmatpush3.msra.mxu0 %v2394_v26  ;;  %2113 = vmatpush3.msra.mxu1 %v2436_v42  ;;  %v72_v26 = vld [vmem:[%s3113_s0] sm:$0xff] }
 0x141   :  { %2075 = vmatprep.subr.mxu0 %v2271_v1  ;;  %2114 = vmatprep.subr.mxu1 %v2271_v1 }
 0x142   :  { %2076 = vmatpush3.msra.mxu0 %v2405_v30  ;;  %2115 = vmatpush3.msra.mxu1 %v2446_v47  ;;  %v104_v30 = vcombine.high %v72_v26, %v72_v26 }
 0x143   :  { %2077 = vmatprep.subr.mxu0 %v2271_v1  ;;  %2116 = vmatprep.subr.mxu1 %v2271_v1 }
 0x144   :  { %2078 = vmatpush3.msra.mxu0 %v2419_v35  ;;  %2117 = vmatpush3.msra.mxu1 %v2462_v53  ;;  %v77_v35 = vld [vmem:[%s3113_s0 + $0x28] sm:$0xff] }
 0x145   :  { %2079 = vmatprep.subr.mxu0 %v2271_v1  ;;  %2118 = vmatprep.subr.mxu1 %v2271_v1  ;;  %v207_v23 = vsel %vm136_vm6, %v77_v35, 0.0 }
 0x146   :  { %2080 = vmatpush3.msra.mxu0 %v2433_v41  ;;  %2119 = vmatpush3.msra.mxu1 %v2475_v59  ;;  %v2777_v41 = vld [vmem:[%s3113_s0 + $0x40] sm:$0xff]  ;;  %v208_v5 = vrot.slane %v207_v23, 4 }
 0x147   :  { %2081 = vmatprep.subr.mxu0 %v2271_v1  ;;  %2120 = vmatprep.subr.mxu1 %v2271_v1 }
 0x148   :  { %2082 = vmatpush3.msra.mxu0 %v2450_v48  ;;  %2121 = vmatpush3.msra.mxu1 %v2493_v2  ;;  %v2787_v48 = vld [vmem:[%s3113_s0 + $0x50] sm:$0xff] }
 0x149   :  { %2083 = vmatprep.subr.mxu0 %v2271_v1  ;;  %2122 = vmatprep.subr.mxu1 %v2271_v1 }
 0x14a   :  { %2084 = vmatpush3.msra.mxu0 %v2460_v52  ;;  %2123 = vmatpush3.msra.mxu1 %v2509_v9 }
 0x14b   :  { %2085 = vmatprep.subr.mxu0 %v2271_v1  ;;  %2124 = vmatprep.subr.mxu1 %v2271_v1 }
 0x14c   :  { %2086 = vmatpush3.msra.mxu0 %v2473_v58  ;;  %2125 = vmatpush3.msra.mxu1 %v2520_v14 }
 0x14d   :  { %2087 = vmatprep.subr.mxu0 %v2271_v1  ;;  %2126 = vmatprep.subr.mxu1 %v2271_v1 }
 0x14e   :  { %2088 = vmatpush3.msra.mxu0 %v2491_v0  ;;  %2127 = vmatpush3.msra.mxu1 %v2537_v20 }
 0x14f   :  { %2089 = vmatprep.subr.mxu0 %v2271_v1  ;;  %2128 = vmatprep.subr.mxu1 %v2271_v1 }
 0x150   :  { %2090 = vmatpush3.msra.mxu0 %v2506_v8  ;;  %2129 = vmatpush3.msra.mxu1 %v2550_v32 }
 0x151   :  { %2091 = vmatprep.subr.mxu0 %v2271_v1  ;;  %2130 = vmatprep.subr.mxu1 %v2271_v1 }
 0x152   :  { %2092 = vmatpush3.msra.mxu0 %v2524_v15  ;;  %2131 = vmatpush3.msra.mxu1 %v2568_v44 }
 0x153   :  { %2093 = vmatprep.subr.mxu0 %v2271_v1  ;;  %2133 = vmatmul.mubr.f32.vlgmr.msra.gmra.mxu1 %v1252_v12 }
 0x154   :  { %2166 = vmatprep.subr.mxu1 %v2271_v1  ;;  %2094 = vmatpush3.msra.mxu0 %v2535_v19  ;;  %v2808_v19 = vld [vmem:[%s3113_s0 + $0x60] sm:$0xff] }
 0x155   :  { %2167 = vmatpush3.msra.mxu1 %v2388_v24  ;;  %2095 = vmatprep.subr.mxu0 %v2271_v1  ;;  %v3128_v24 = vand.u32 4294901760, %v2578_v55  ;;  %v116_v45 = vcombine.high %v2808_v19, %v2808_v19 }
 0x156   :  { %2168 = vmatprep.subr.mxu1 %v2271_v1  ;;  %2096 = vmatpush3.msra.mxu0 %v2548_v28 }
 0x157   :  { %2169 = vmatpush3.msra.mxu1 %v2396_v27  ;;  %2097 = vmatprep.subr.mxu0 %v2271_v1  ;;  %v73_v27 = vld [vmem:[%s3113_s0 + $0x8] sm:$0xff] }
 0x158   :  { %2170 = vmatprep.subr.mxu1 %v2271_v1  ;;  %2098 = vmatpush3.msra.mxu0 %v2566_v43  ;;  %v151_v8 = vsel %vm136_vm6, %v73_v27, 0.0 }
 0x159   :  { %2171 = vmatpush3.msra.mxu1 %v2407_v31  ;;  %2099 = vmatprep.subr.mxu0 %v2271_v1  ;;  %v75_v31 = vld [vmem:[%s3113_s0 + $0x18] sm:$0xff] }
 0x15a   :  { %2172 = vmatprep.subr.mxu1 %v2271_v1  ;;  %2100 = vmatpush3.msra.mxu0 %v2578_v55 }
 0x15b   :  { %2101 = vmatprep.mubr.msk.f32.mxu0 %vm2272_vm0, %v2271_v1  ;;  %2173 = vmatpush3.msra.mxu1 %v2421_v36  ;;  %v78_v36 = vld [vmem:[%s3113_s0 + $0x30] sm:$0xff] }
 0x15c   :  { %2102 = vmatmul.mubr.f32.vlgmr.msra.gmra.mxu0 %v2607_v61  ;;  %2135 = vmatprep.subr.mxu0 %v2271_v1  ;;  %v110_v0 = vcombine.high %v78_v36, %v78_v36  ;;  %v221_v3 = vsel %vm136_vm6, %v78_v36, 0.0 }
 0x15d   :  { %2174 = vmatprep.subr.mxu1 %v2271_v1  ;;  %2136 = vmatpush3.msra.mxu0 %v1267_v29  ;;  %v137_v29 = vsel %vm136_vm6, %v72_v26, 0.0 }
 0x15e   :  { %2175 = vmatpush3.msra.mxu1 %v2436_v42  ;;  %2137 = vmatprep.subr.mxu0 %v2271_v1  ;;  %v105_v42 = vcombine.high %v73_v27, %v73_v27  ;;  %v228_v26 = vsel %vm136_vm6, %v110_v0, 0.0  ;;  %v2841_v27 = vld [vmem:[%s3113_s0 + $0x78] sm:$0xff] }
 0x15f   :  { %2176 = vmatprep.subr.mxu1 %v2271_v1  ;;  %2138 = vmatpush3.msra.mxu0 %v1274_v34  ;;  %v76_v34 = vld [vmem:[%s3113_s0 + $0x20] sm:$0xff] }
 0x160   :  { %2177 = vmatpush3.msra.mxu1 %v2446_v47  ;;  %2139 = vmatprep.subr.mxu0 %v2271_v1  ;;  %v2782_v47 = vld [vmem:[%s3113_s0 + $0x48] sm:$0xff]  ;;  %v108_v58 = vcombine.high %v76_v34, %v76_v34  ;;  %v158_v15 = vsel %vm136_vm6, %v105_v42, 0.0 }
 0x161   :  { %2178 = vmatprep.subr.mxu1 %v2271_v1  ;;  %2140 = vmatpush3.msra.mxu0 %v1281_v40  ;;  %v2772_v40 = vld [vmem:[%s3113_s0 + $0x38] sm:$0xff]  ;;  %v159_v55 = vrot.slane %v158_v15, 4 }
 0x162   :  { %2179 = vmatpush3.msra.mxu1 %v2462_v53  ;;  %2141 = vmatprep.subr.mxu0 %v2271_v1  ;;  %v398_v53 = vlaneseq  ;;  %v200_v17 = vsel %vm136_vm6, %v108_v58, 0.0  ;;  %v235_v42 = vsel %vm136_vm6, %v2772_v40, 0.0  ;;  %v229_v58 = vrot.slane %v228_v26, 4 }
 0x163   :  { %2180 = vmatprep.subr.mxu1 %v2271_v1  ;;  %2142 = vmatpush3.msra.mxu0 %v1288_v46  ;;  %v138_v46 = vrot.slane %v137_v29, 4  ;;  %v201_v4 = vrot.slane %v200_v17, 4  ;;  %v160_v12 = vadd.f32 %v159_v55, %v158_v15 }
 0x164   :  { %2181 = vmatpush3.msra.mxu1 %v2475_v59  ;;  %2143 = vmatprep.subr.mxu0 %v2271_v1  ;;  %v109_v59 = vcombine.high %v77_v35, %v77_v35  ;;  %v209_v35 = vadd.f32 %v208_v5, %v207_v23  ;;  %v230_v23 = vadd.f32 %v229_v58, %v228_v26 }
 0x165   :  { %2182 = vmatprep.subr.mxu1 %v2271_v1  ;;  %2144 = vmatpush3.msra.mxu0 %v1295_v54  ;;  %v2792_v54 = vld [vmem:[%s3113_s0 + $0x58] sm:$0xff] }
 0x166   :  { %2183 = vmatpush3.msra.mxu1 %v2493_v2  ;;  %2145 = vmatprep.subr.mxu0 %v2271_v1  ;;  %v111_v2 = vcombine.high %v2772_v40, %v2772_v40  ;;  %v214_v22 = vsel %vm136_vm6, %v109_v59, 0.0  ;;  %v119_v59 = vcombine.high %v2841_v27, %v2841_v27 }
 0x167   :  { %2184 = vmatprep.subr.mxu1 %v2271_v1  ;;  %2146 = vmatpush3.msra.mxu0 %v1302_v57  ;;  %v107_v57 = vcombine.high %v75_v31, %v75_v31  ;;  %v215_v6 = vrot.slane %v214_v22, 4 }
 0x168   :  { %2185 = vmatpush3.msra.mxu1 %v2509_v9  ;;  %2147 = vmatprep.subr.mxu0 %v2271_v1  ;;  %v113_v9 = vcombine.high %v2782_v47, %v2782_v47 }
 0x169   :  { %2186 = vmatprep.subr.mxu1 %v2271_v1  ;;  %2148 = vmatpush3.msra.mxu0 %v1309_v63  ;;  %v144_v63 = vsel %vm136_vm6, %v104_v30, 0.0  ;;  %v186_v43 = vsel %vm136_vm6, %v107_v57, 0.0  ;;  %v216_v36 = vadd.f32 %v215_v6, %v214_v22  ;;  %v161_v57 = vrot.slane %v160_v12, 2 }
 0x16a   :  { %2187 = vmatpush3.msra.mxu1 %v2520_v14  ;;  %2149 = vmatprep.subr.mxu0 %v2271_v1  ;;  %v139_v14 = vadd.f32 %v138_v46, %v137_v29  ;;  %v187_v56 = vrot.slane %v186_v43, 4 }
 0x16b   :  { %2188 = vmatprep.subr.mxu1 %v2271_v1  ;;  %2150 = vmatpush3.msra.mxu0 %v1316_v7  ;;  %v112_v7 = vcombine.high %v2777_v41, %v2777_v41 }
 0x16c   :  { %2189 = vmatpush3.msra.mxu1 %v2537_v20  ;;  %2151 = vmatprep.subr.mxu0 %v2271_v1  ;;  %v115_v20 = vcombine.high %v2792_v54, %v2792_v54  ;;  %v140_v37 = vrot.slane %v139_v14, 2  ;;  %v188_v30 = vadd.f32 %v187_v56, %v186_v43  ;;  %v217_v43 = vrot.slane %v216_v36, 2 }
 0x16d   :  { %2190 = vmatprep.subr.mxu1 %v2271_v1  ;;  %2152 = vmatpush3.msra.mxu0 %v1323_v13  ;;  %v114_v13 = vcombine.high %v2787_v48, %v2787_v48 }
 0x16e   :  { %2191 = vmatpush3.msra.mxu1 %v2550_v32  ;;  %2153 = vmatprep.subr.mxu0 %v2271_v1  ;;  %v152_v32 = vrot.slane %v151_v8, 4  ;;  %v141_v29 = vadd.f32 %v140_v37, %v139_v14  ;;  %v189_v15 = vrot.slane %v188_v30, 2 }
 0x16f   :  { %2192 = vmatprep.subr.mxu1 %v2271_v1  ;;  %2154 = vmatpush3.msra.mxu0 %v1330_v21  ;;  %v145_v21 = vrot.slane %v144_v63, 4 }
 0x170   :  { %2193 = vmatpush3.msra.mxu1 %v2568_v44  ;;  %2194 = vmatprep.mubr.msk.f32.mxu1 %vm2272_vm0, %v2271_v1  ;;  %v193_v44 = vsel %vm136_vm6, %v76_v34, 0.0  ;;  %v153_v61 = vadd.f32 %v152_v32, %v151_v8  ;;  %v202_v34 = vadd.f32 %v201_v4, %v200_v17  ;;  %v162_v17 = vadd.f32 %v161_v57, %v160_v12 }
 0x171   :  { %2155 = vmatprep.subr.mxu0 %v2271_v1  ;;  %2195 = vmatmul.mubr.f32.vlgmr.msra.gmra.mxu1 %v2604_v10  ;;  %v194_v62 = vrot.slane %v193_v44, 4  ;;  %v190_v56 = vadd.f32 %v189_v15, %v188_v30 }
 0x172   :  { %2156 = vmatpush3.msra.mxu0 %v1337_v25  ;;  %2163 = vmatprep.mubr.msk.f32.mxu0 %vm2272_vm0, %v2271_v1  ;;  %v203_v32 = vrot.slane %v202_v34, 2 }
 0x173   :  { %2157 = vmatprep.subr.mxu0 %v2271_v1  ;;  %v191_v57 = vrot.slane %v190_v56, 1 }
 0x174   :  { %2158 = vmatpush3.msra.mxu0 %v1344_v39  ;;  %v179_v39 = vsel %vm136_vm6, %v75_v31, 0.0  ;;  %v195_v31 = vadd.f32 %v194_v62, %v193_v44  ;;  %v204_v5 = vadd.f32 %v203_v32, %v202_v34 }
 0x175   :  { %2159 = vmatprep.subr.mxu0 %v2271_v1  ;;  %v180_v49 = vrot.slane %v179_v39, 4 }
 0x176   :  { %2160 = vmatpush3.msra.mxu0 %v1351_v51  ;;  %v2820_v51 = vld [vmem:[%s3113_s0 + $0x68] sm:$0xff]  ;;  %v205_v30 = vrot.slane %v204_v5, 1 }
 0x177   :  { %2161 = vmatprep.subr.mxu0 %v2271_v1  ;;  %v74_v1 = vld [vmem:[%s3113_s0 + $0x10] sm:$0xff]  ;;  %v117_v60 = vcombine.high %v2820_v51, %v2820_v51 }
 0x178   :  { %2162 = vmatpush3.msra.mxu0 %v3128_v24  ;;  %v106_v52 = vcombine.high %v74_v1, %v74_v1  ;;  %v165_v25 = vsel %vm136_vm6, %v74_v1, 0.0  ;;  %v222_v24 = vrot.slane %v221_v3, 4  ;;  %v181_v1 = vadd.f32 %v180_v49, %v179_v39 }
 0x179   :  { %2164 = vmatmul.mubr.f32.vlgmr.msra.gmra.mxu0 %v2604_v10  ;;  %v166_v38 = vrot.slane %v165_v25, 4  ;;  %v146_v10 = vadd.f32 %v145_v21, %v144_v63  ;;  %v196_v21 = vrot.slane %v195_v31, 2  ;;  %v210_v39 = vrot.slane %v209_v35, 2 }
 0x17a   :  { %v172_v28 = vsel %vm136_vm6, %v106_v52, 0.0  ;;  %v154_v52 = vrot.slane %v153_v61, 2  ;;  %v223_v8 = vadd.f32 %v222_v24, %v221_v3  ;;  %v182_v14 = vrot.slane %v181_v1, 2 }
 0x17b   :  { %v173_v50 = vrot.slane %v172_v28, 4  ;;  %v167_v18 = vadd.f32 %v166_v38, %v165_v25  ;;  %v147_v46 = vrot.slane %v146_v10, 2  ;;  %v236_v25 = vrot.slane %v235_v42, 4 }
 0x17c   :  { %v155_v55 = vadd.f32 %v154_v52, %v153_v61  ;;  %v224_v38 = vrot.slane %v223_v8, 2  ;;  %v183_v49 = vadd.f32 %v182_v14, %v181_v1  ;;  %v197_v62 = vadd.f32 %v196_v21, %v195_v31 }
 0x17d   :  { %v174_v16 = vadd.f32 %v173_v50, %v172_v28  ;;  %v168_v63 = vrot.slane %v167_v18, 2  ;;  %v142_v28 = vrot.slane %v141_v29, 1  ;;  %v148_v44 = vadd.f32 %v147_v46, %v146_v10 }
 0x17e   :  { %v242_v50 = vsel %vm136_vm6, %v111_v2, 0.0  ;;  %v237_v3 = vadd.f32 %v236_v25, %v235_v42  ;;  %v211_v6 = vadd.f32 %v210_v39, %v209_v35  ;;  %v218_v10 = vadd.f32 %v217_v43, %v216_v36 }
 0x17f   :  { %v175_v0 = vrot.slane %v174_v16, 2  ;;  %v169_v22 = vadd.f32 %v168_v63, %v167_v18  ;;  %v2851_v4 = vadd.f32 %v142_v28, %v141_v29  ;;  %v149_v61 = vrot.slane %v148_v44, 1 }
 0x180   :  { %v156_v12 = vrot.slane %v155_v55, 1  ;;  %v231_v24 = vrot.slane %v230_v23, 2  ;;  %v243_v18 = vrot.slane %v242_v50, 4  ;;  %v225_v52 = vadd.f32 %v224_v38, %v223_v8 }
 0x181   :  { %v176_v37 = vadd.f32 %v175_v0, %v174_v16  ;;  %v163_v16 = vrot.slane %v162_v17, 1  ;;  %v170_v26 = vrot.slane %v169_v22, 1  ;;  %v184_v40 = vrot.slane %v183_v49, 1 }
 0x182   :  { %v198_v2 = vrot.slane %v197_v62, 1  ;;  %v238_v1 = vrot.slane %v237_v3, 2  ;;  %v212_v31 = vrot.slane %v211_v6, 1  ;;  %v219_v42 = vrot.slane %v218_v10, 1 }
 0x183   :  { %v177_v46 = vrot.slane %v176_v37, 1  ;;  %v249_v29 = vsel %vm136_vm6, %v2777_v41, 0.0  ;;  %v2855_v34 = vadd.f32 %v149_v61, %v148_v44  ;;  %v2857_v35 = vadd.f32 %v156_v12, %v155_v55 }
 0x184   :  { %v232_v36 = vadd.f32 %v231_v24, %v230_v23  ;;  %v244_v58 = vadd.f32 %v243_v18, %v242_v50  ;;  %v2859_v63 = vadd.f32 %v163_v16, %v162_v17  ;;  %v2861_v0 = vadd.f32 %v170_v26, %v169_v22 }
 0x185   :  { %v2863_v8 = vadd.f32 %v177_v46, %v176_v37  ;;  %v226_v14 = vrot.slane %v225_v52, 1  ;;  %v2865_v15 = vadd.f32 %v184_v40, %v183_v49  ;;  %v2867_v21 = vadd.f32 %v191_v57, %v190_v56 }
 0x186   :  { %v239_v25 = vadd.f32 %v238_v1, %v237_v3  ;;  %v250_v28 = vrot.slane %v249_v29, 4  ;;  %v2869_v32 = vadd.f32 %v198_v2, %v197_v62  ;;  %v2871_v39 = vadd.f32 %v205_v30, %v204_v5 }
 0x187   :  { %v2873_v43 = vadd.f32 %v212_v31, %v211_v6  ;;  %v2875_v44 = vadd.f32 %v219_v42, %v218_v10  ;;  %v233_v55 = vrot.slane %v232_v36, 1  ;;  %v245_v17 = vrot.slane %v244_v58, 2 }
 0x188   :  { %v256_v23 = vsel %vm136_vm6, %v112_v7, 0.0  ;;  %v263_v22 = vsel %vm136_vm6, %v2782_v47, 0.0  ;;  %v2883_v37 = vadd.f32 %v226_v14, %v225_v52  ;;  %v270_v38 = vsel %vm136_vm6, %v113_v9, 0.0 }
 0x189   :  { %v277_v50 = vsel %vm136_vm6, %v2787_v48, 0.0  ;;  %v284_v41 = vsel %vm136_vm6, %v114_v13, 0.0  ;;  %v240_v49 = vrot.slane %v239_v25, 1  ;;  %v251_v7 = vadd.f32 %v250_v28, %v249_v29 }
 0x18a   :  { %v291_v56 = vsel %vm136_vm6, %v2792_v54, 0.0  ;;  %v298_v47 = vsel %vm136_vm6, %v115_v20, 0.0  ;;  %v257_v62 = vrot.slane %v256_v23, 4  ;;  %v264_v9 = vrot.slane %v263_v22, 4 }
 0x18b   :  { %v305_v3 = vsel %vm136_vm6, %v2808_v19, 0.0  ;;  %v312_v48 = vsel %vm136_vm6, %v116_v45, 0.0  ;;  %v271_v13 = vrot.slane %v270_v38, 4  ;;  %v278_v5 = vrot.slane %v277_v50, 4 }
 0x18c   :  { %v285_v6 = vrot.slane %v284_v41, 4  ;;  %v319_v10 = vsel %vm136_vm6, %v2820_v51, 0.0  ;;  %v2909_v61 = vadd.f32 %v233_v55, %v232_v36  ;;  %v246_v54 = vadd.f32 %v245_v17, %v244_v58 }
 0x18d   :  { %v292_v20 = vrot.slane %v291_v56, 4  ;;  %v299_v12 = vrot.slane %v298_v47, 4  ;;  %v252_v24 = vrot.slane %v251_v7, 2  ;;  %v306_v18 = vrot.slane %v305_v3, 4 }
 0x18e   :  { %v313_v16 = vrot.slane %v312_v48, 4  ;;  %v326_v19 = vsel %vm136_vm6, %v117_v60, 0.0  ;;  %v258_v45 = vadd.f32 %v257_v62, %v256_v23  ;;  %v265_v26 = vadd.f32 %v264_v9, %v263_v22 }
 0x18f   :  { %v320_v46 = vrot.slane %v319_v10, 4  ;;  %v333_v52 = vsel %vm136_vm6, %v2828_v33, 0.0  ;;  %v272_v40 = vadd.f32 %v271_v13, %v270_v38  ;;  %v279_v57 = vadd.f32 %v278_v5, %v277_v50 }
 0x190   :  { %v286_v2 = vadd.f32 %v285_v6, %v284_v41  ;;  %v340_v1 = vsel %vm136_vm6, %v118_v11, 0.0  ;;  %v247_v30 = vrot.slane %v246_v54, 1  ;;  %v293_v31 = vadd.f32 %v292_v20, %v291_v56 }
 0x191   :  { %v300_v42 = vadd.f32 %v299_v12, %v298_v47  ;;  %v327_v51 = vrot.slane %v326_v19, 4  ;;  %v2921_v29 = vadd.f32 %v240_v49, %v239_v25  ;;  %v307_v60 = vadd.f32 %v306_v18, %v305_v3 }
 0x192   :  { %v314_v36 = vadd.f32 %v313_v16, %v312_v48  ;;  %v334_v58 = vrot.slane %v333_v52, 4  ;;  %v259_v14 = vrot.slane %v258_v45, 2  ;;  %v266_v28 = vrot.slane %v265_v26, 2 }
 0x193   :  { %v321_v55 = vadd.f32 %v320_v46, %v319_v10  ;;  %v341_v17 = vrot.slane %v340_v1, 4  ;;  %v253_v23 = vadd.f32 %v252_v24, %v251_v7  ;;  %v273_v22 = vrot.slane %v272_v40, 2 }
 0x194   :  { %v280_v38 = vrot.slane %v279_v57, 2  ;;  %v287_v50 = vrot.slane %v286_v2, 2  ;;  %v2925_v11 = vadd.f32 %v247_v30, %v246_v54  ;;  %v294_v41 = vrot.slane %v293_v31, 2 }
 0x195   :  { %v301_v56 = vrot.slane %v300_v42, 2  ;;  %v328_v47 = vadd.f32 %v327_v51, %v326_v19  ;;  %v308_v25 = vrot.slane %v307_v60, 2  ;;  %v315_v49 = vrot.slane %v314_v36, 2 }
 0x196   :  { %v335_v62 = vadd.f32 %v334_v58, %v333_v52  ;;  %v347_v9 = vsel %vm136_vm6, %v2841_v27, 0.0  ;;  %v260_v48 = vadd.f32 %v259_v14, %v258_v45  ;;  %v267_v13 = vadd.f32 %v266_v28, %v265_v26 }
 0x197   :  { %v322_v7 = vrot.slane %v321_v55, 2  ;;  %v342_v5 = vadd.f32 %v341_v17, %v340_v1  ;;  %v254_v6 = vrot.slane %v253_v23, 1  ;;  %v274_v10 = vadd.f32 %v273_v22, %v272_v40 }
 0x198   :  { %v281_v20 = vadd.f32 %v280_v38, %v279_v57  ;;  %v288_v12 = vadd.f32 %v287_v50, %v286_v2  ;;  %v295_v54 = vadd.f32 %v294_v41, %v293_v31  ;;  %v302_v24 = vadd.f32 %v301_v56, %v300_v42 }
 0x199   :  { %v329_v18 = vrot.slane %v328_v47, 2  ;;  %v348_v16 = vrot.slane %v347_v9, 4  ;;  %v309_v19 = vadd.f32 %v308_v25, %v307_v60  ;;  %v316_v46 = vadd.f32 %v315_v49, %v314_v36 }
 0x19a   :  { %v336_v30 = vrot.slane %v335_v62, 2  ;;  %v354_v52 = vsel %vm136_vm6, %v119_v59, 0.0  ;;  %v261_v45 = vrot.slane %v260_v48, 1  ;;  %v268_v26 = vrot.slane %v267_v13, 1 }
 0x19b   :  { %v323_v51 = vadd.f32 %v322_v7, %v321_v55  ;;  %v343_v1 = vrot.slane %v342_v5, 2  ;;  %v255_v58 = vadd.f32 %v254_v6, %v253_v23  ;;  %v275_v40 = vrot.slane %v274_v10, 1 }
 0x19c   :  { %v282_v57 = vrot.slane %v281_v20, 1  ;;  %v289_v2 = vrot.slane %v288_v12, 1  ;;  %v296_v42 = vrot.slane %v295_v54, 1  ;;  %v330_v14 = vadd.f32 %v329_v18, %v328_v47 }
 0x19d   :  { %v349_v60 = vadd.f32 %v348_v16, %v347_v9  ;;  %v355_v36 = vrot.slane %v354_v52, 4  ;;  %v303_v28 = vrot.slane %v302_v24, 1  ;;  %v310_v17 = vrot.slane %v309_v19, 1 }
 0x19e   :  { %v317_v22 = vrot.slane %v316_v46, 1  ;;  %v337_v27 = vadd.f32 %v336_v30, %v335_v62  ;;  %v262_v59 = vadd.f32 %v261_v45, %v260_v48  ;;  %v269_v50 = vadd.f32 %v268_v26, %v267_v13 }
 0x19f   :  { %v324_v41 = vrot.slane %v323_v51, 1  ;;  %v344_v55 = vadd.f32 %v343_v1, %v342_v5  ;;  %v276_v56 = vadd.f32 %v275_v40, %v274_v10  ;;  %v283_v23 = vadd.f32 %v282_v57, %v281_v20 }
 0x1a0   :  { %v290_v25 = vadd.f32 %v289_v2, %v288_v12  ;;  %v2936_v49 = vshrl.u32 %v398_v53, 7  ;;  %v331_v7 = vrot.slane %v330_v14, 1  ;;  %v350_v47 = vrot.slane %v349_v60, 2 }
 0x1a1   :  { %v356_v9 = vadd.f32 %v355_v36, %v354_v52  ;;  %v2938_v6 = vadd.f32 %v303_v28, %v302_v24  ;;  %v2940_v18 = vadd.f32 %v310_v17, %v309_v19  ;;  %v2942_v62 = vadd.f32 %v317_v22, %v316_v46  ;;  %v394_v52 = vld [vmem:[#allocation3] sm:$0xff] }
 0x1a2   :  { %v338_v48 = vrot.slane %v337_v27, 1  ;;  %v2944_v13 = vadd.f32 %v324_v41, %v323_v51  ;;  %v345_v5 = vrot.slane %v344_v55, 1  ;;  %v362_v10 = vmul.f32 0.25, %v2851_v4 }
 0x1a3   :  { %v363_v20 = vmul.f32 0.25, %v2855_v34  ;;  %v364_v53 = vmul.f32 0.25, %v2857_v35  ;;  %v400_v12 = vsub.s32 0, %v2936_v49  ;;  %v408_v24 = vsub.s32 2, %v2936_v49 }
 0x1a4   :  { %v2952_v16 = vadd.f32 %v331_v7, %v330_v14  ;;  %v351_v19 = vadd.f32 %v350_v47, %v349_v60  ;;  %v357_v46 = vrot.slane %v356_v9, 2  ;;  %v365_v30 = vmul.f32 0.25, %v2859_v63 }
 0x1a5   :  { %v2955_v45 = vadd.f32 %v338_v48, %v337_v27  ;;  %v366_v4 = vmul.f32 0.25, %v2861_v0  ;;  %v2959_v34 = vmul.f32 0.25, %v2863_v8  ;;  %v412_v35 = vsub.s32 3, %v2936_v49 }
 0x1a6   :  { %v2962_v26 = vadd.f32 %v345_v5, %v344_v55  ;;  %v378_v51 = vmul.f32 0.25, %v255_v58  ;;  %v379_v1 = vmul.f32 0.25, %v262_v59  ;;  %v380_v40 = vmul.f32 0.25, %v269_v50 }
 0x1a7   :  { %v401_v57 = vrot.slane %v394_v52, %v400_v12  ;;  %v409_v2 = vrot.slane %v394_v52, %v408_v24  ;;  %v416_v0 = vsub.s32 4, %v2936_v49  ;;  %v352_v8 = vrot.slane %v351_v19, 1 }
 0x1a8   :  { %v368_v14 = vmul.f32 0.25, %v2865_v15  ;;  %v2973_v60 = vmul.f32 0.25, %v2867_v21  ;;  %v2976_v58 = vmul.f32 0.25, %v2869_v32  ;;  %v381_v36 = vmul.f32 0.25, %v276_v56 }
 0x1a9   :  { %v413_v28 = vrot.slane %v394_v52, %v412_v35  ;;  %v420_v17 = vsub.s32 5, %v2936_v49  ;;  %v2982_v22 = vmul.f32 0.25, %v2871_v39  ;;  %v2985_v27 = vmul.f32 0.25, %v2873_v43 }
 0x1aa   :  { %v382_v15 = vmul.f32 0.25, %v283_v23  ;;  %v424_v21 = vsub.s32 6, %v2936_v49  ;;  %v494_v32 = vmul.f32 %v401_v57, %v378_v51  ;;  %v496_v50 = vmul.f32 %v409_v2, %v380_v40 }
 0x1ab   :  { %v2990_v41 = vadd.f32 %v352_v8, %v351_v19  ;;  %v2993_v56 = vmul.f32 0.25, %v2875_v44  ;;  %v383_v39 = vmul.f32 0.25, %v290_v25  ;;  %v421_v43 = vrot.slane %v394_v52, %v420_v17  ;;  %v3000_v19 = vld [vmem:[#allocation3 + $0x8] sm:$0xff] }
 0x1ac   :  { %v428_v23 = vsub.s32 7, %v2936_v49  ;;  %v497_v47 = vmul.f32 %v413_v28, %v381_v36  ;;  %v478_v48 = vmul.f32 %v401_v57, %v362_v10  ;;  %v547_v40 = vrot.slane %v496_v50, 7 }
 0x1ad   :  { %v3007_v8 = vmul.f32 0.25, %v2883_v37  ;;  %v3010_v36 = vmul.f32 0.25, %v2909_v61  ;;  %v385_v10 = vmul.f32 0.25, %v2938_v6  ;;  %v499_v57 = vmul.f32 %v421_v43, %v383_v39 }
 0x1f7   :  { %v2923_v33 = vpop.f32.mrf.mxu1 }
 0x1f9   :  { %v2072_v3 = vpop.f32.mrf.mxu1 }
 0x1fa   :  { %v297_v3 = vadd.f32 %v296_v42, %v295_v54  ;;  %v404_v54 = vsub.s32 1, %v2936_v49  ;;  %v358_v42 = vadd.f32 %v357_v46, %v356_v9  ;;  %v425_v9 = vrot.slane %v394_v52, %v424_v21 }
 0x1fb   :  { %v480_v46 = vmul.f32 %v409_v2, %v364_v53  ;;  %v481_v53 = vmul.f32 %v413_v28, %v365_v30  ;;  %v387_v30 = vmul.f32 0.25, %v2942_v62 }
 0x1fc   :  { %v405_v63 = vrot.slane %v394_v52, %v404_v54  ;;  %v359_v55 = vrot.slane %v358_v42, 1  ;;  %v384_v7 = vmul.f32 0.25, %v297_v3  ;;  %v484_v39 = vmul.f32 %v425_v9, %v368_v14 }
 0x1fd   :  { %v548_v6 = vsel %vm543_vm7, %v547_v40, %v480_v46  ;;  %v390_v40 = vmul.f32 0.25, %v2955_v45  ;;  %v453_v45 = vrot.slane %v3000_v19, %v420_v17 }
 0x1fe   :  { %v495_v59 = vmul.f32 %v405_v63, %v379_v1  ;;  %v479_v5 = vmul.f32 %v405_v63, %v363_v20  ;;  %v542_v1 = vrot.slane %v494_v32, 7  ;;  %v3004_v3 = vadd.f32 %v359_v55, %v358_v42 }
 0x1ff   :  { %v2933_v31 = vpop.f32.mrf.mxu0  ;;  %v429_v20 = vrot.slane %v394_v52, %v428_v23  ;;  %v549_v63 = vrot.slane %v497_v47, 7  ;;  %v433_v42 = vrot.slane %v3000_v19, %v400_v12  ;;  %v500_v32 = vmul.f32 %v425_v9, %v384_v7 }
 0x200   :  { %v545_v44 = vrot.slane %v495_v59, 7  ;;  %v544_v61 = vsel %vm543_vm7, %v542_v1, %v478_v48  ;;  %v441_v12 = vrot.slane %v3000_v19, %v408_v24  ;;  %v553_v55 = vrot.slane %v499_v57, 7 }
 0x201   :  { %v2041_v38 = vpop.f32.mrf.mxu0  ;;  %v501_v28 = vmul.f32 %v429_v20, %v385_v10  ;;  %v592_v7 = vsel %vm591_vm8, %v544_v61, 0.0  ;;  %v555_v48 = vrot.slane %v500_v32, 7  ;;  %v389_v24 = vmul.f32 0.25, %v2952_v16 }
 0x202   :  { %v417_v38 = vrot.slane %v394_v52, %v416_v0  ;;  %v546_v59 = vsel %vm543_vm7, %v545_v44, %v479_v5  ;;  %v388_v52 = vmul.f32 0.25, %v2944_v13  ;;  %v595_v13 = vsel %vm591_vm8, %v548_v6, 0.0 }
 0x203   :  { %v593_v62 = vsel %vm591_vm8, %v546_v59, 0.0  ;;  %v557_v1 = vrot.slane %v501_v28, 7  ;;  %v449_v16 = vrot.slane %v3000_v19, %v416_v0  ;;  %v486_v10 = vmul.f32 %v433_v42, %v2976_v58 }
 0x204   :  { %v498_v51 = vmul.f32 %v417_v38, %v382_v15  ;;  %v386_v15 = vmul.f32 0.25, %v2940_v18  ;;  %v482_v37 = vmul.f32 %v417_v38, %v366_v4  ;;  %v437_v18 = vrot.slane %v3000_v19, %v404_v54 }
 0x205   :  { %v483_v4 = vmul.f32 %v421_v43, %v2959_v34  ;;  %v550_v38 = vsel %vm543_vm7, %v549_v63, %v481_v53  ;;  %v594_v5 = vadd.f32 %v593_v62, %v592_v7  ;;  %v445_v34 = vrot.slane %v3000_v19, %v412_v35 }
 0x206   :  { %v551_v50 = vrot.slane %v498_v51, 7  ;;  %v502_v47 = vmul.f32 %v433_v42, %v386_v15  ;;  %v485_v43 = vmul.f32 %v429_v20, %v2973_v60  ;;  %v597_v14 = vsel %vm591_vm8, %v550_v38, 0.0 }
 0x207   :  { %v503_v46 = vmul.f32 %v437_v18, %v387_v30  ;;  %v554_v51 = vsel %vm543_vm7, %v553_v55, %v483_v4  ;;  %v596_v44 = vadd.f32 %v595_v13, %v594_v5  ;;  %v504_v20 = vmul.f32 %v441_v12, %v388_v52 }
 0x208   :  { %v552_v54 = vsel %vm543_vm7, %v551_v50, %v482_v37  ;;  %v556_v53 = vsel %vm543_vm7, %v555_v48, %v484_v39  ;;  %v559_v57 = vrot.slane %v502_v47, 7  ;;  %v487_v15 = vmul.f32 %v437_v18, %v2982_v22 }
 0x209   :  { %v599_v35 = vsel %vm591_vm8, %v552_v54, 0.0  ;;  %v598_v63 = vadd.f32 %v597_v14, %v596_v44  ;;  %v601_v0 = vsel %vm591_vm8, %v554_v51, 0.0  ;;  %v505_v37 = vmul.f32 %v445_v34, %v389_v24 }
 0x20a   :  { %v558_v58 = vsel %vm543_vm7, %v557_v1, %v485_v43  ;;  %v561_v42 = vrot.slane %v503_v46, 7  ;;  %v392_v61 = vmul.f32 0.25, %v2990_v41  ;;  %v457_v59 = vrot.slane %v3000_v19, %v424_v21 }
 0x20b   :  { %v600_v32 = vadd.f32 %v599_v35, %v598_v63  ;;  %v603_v6 = vsel %vm591_vm8, %v556_v53, 0.0  ;;  %v506_v17 = vmul.f32 %v449_v16, %v390_v40  ;;  %v560_v22 = vsel %vm543_vm7, %v559_v57, %v486_v10 }
 0x20c   :  { %v563_v50 = vrot.slane %v504_v20, 7  ;;  %v393_v52 = vmul.f32 0.25, %v3004_v3  ;;  %v461_v18 = vrot.slane %v3000_v19, %v428_v23  ;;  %v489_v41 = vmul.f32 %v445_v34, %v2993_v56 }
 0x20d   :  { %v602_v30 = vadd.f32 %v601_v0, %v600_v32  ;;  %v605_v4 = vsel %vm591_vm8, %v558_v58, 0.0  ;;  %v376_v38 = vmul.f32 0.25, %v2921_v29  ;;  %v490_v55 = vmul.f32 %v449_v16, %v3007_v8 }
 0x20e   :  { %v607_v39 = vsel %vm591_vm8, %v560_v22, 0.0  ;;  %v508_v3 = vmul.f32 %v457_v59, %v392_v61  ;;  %v567_v7 = vrot.slane %v506_v17, 7  ;;  %v377_v56 = vmul.f32 0.25, %v2925_v11  ;;  %v1856_v11 = vld [vmem:[%s3121_s8] ss:$0 sm:$0xff] }
 0x20f   :  { %v604_v28 = vadd.f32 %v603_v6, %v602_v30  ;;  %v491_v19 = vmul.f32 %v453_v45, %v3010_v36  ;;  %v509_v13 = vmul.f32 %v461_v18, %v393_v52  ;;  %v492_v48 = vmul.f32 %v457_v59, %v376_v38 }
 0x210   :  { %v568_v5 = vsel %vm543_vm7, %v567_v7, %v490_v55  ;;  %v571_v24 = vrot.slane %v508_v3, 7  ;;  %v493_v43 = vmul.f32 %v461_v18, %v377_v56  ;;  %v1257_v44 = vadd.f32 %v1856_v11, %v2933_v31  ;;  %v1859_v56 = vld [vmem:[%s3124_s11] ss:$0 sm:$0xff] }
 0x211   :  { %v606_v23 = vadd.f32 %v605_v4, %v604_v28  ;;  %v573_v46 = vrot.slane %v509_v13, 7  ;;  %v615_v1 = vsel %vm591_vm8, %v568_v5, 0.0 }
 0x212   :  { %v572_v40 = vsel %vm543_vm7, %v571_v24, %v492_v48  ;;  %v1398_v57 = vadd.f32 %v2923_v33, %v1257_v44 }
 0x213   :  { %v3002_v25 = vpop.f32.mrf.mxu1  ;;  %v608_v29 = vadd.f32 %v607_v39, %v606_v23  ;;  %v574_v35 = vsel %vm543_vm7, %v573_v46, %v493_v43  ;;  %v619_v53 = vsel %vm591_vm8, %v572_v40, 0.0  ;;  %v1857_v39 = vld [vmem:[%s3122_s9] ss:$0 sm:$0xff] }
 0x215   :  { %v2134_v2 = vpop.f32.mrf.mxu1 }
 0x216   :  { %v391_v2 = vmul.f32 0.25, %v2962_v26  ;;  %v488_v26 = vmul.f32 %v441_v12, %v2985_v27  ;;  %v562_v27 = vsel %vm543_vm7, %v561_v42, %v487_v15  ;;  %v565_v12 = vrot.slane %v505_v37, 7 }
 0x217   :  { %v609_v62 = vsel %vm591_vm8, %v562_v27, 0.0 }
 0x218   :  { %v507_v21 = vmul.f32 %v453_v45, %v391_v2  ;;  %v564_v49 = vsel %vm543_vm7, %v563_v50, %v488_v26  ;;  %v566_v47 = vsel %vm543_vm7, %v565_v12, %v489_v41  ;;  %v610_v34 = vadd.f32 %v609_v62, %v608_v29 }
 0x219   :  { %v611_v8 = vsel %vm591_vm8, %v564_v49, 0.0  ;;  %v613_v36 = vsel %vm591_vm8, %v566_v47, 0.0  ;;  %v621_v45 = vsel %vm591_vm8, %v574_v35, 0.0  ;;  %v1858_v49 = vld [vmem:[%s3123_s10] ss:$0 sm:$0xff] }
 0x21a   :  { %v569_v54 = vrot.slane %v507_v21, 7  ;;  %v612_v51 = vadd.f32 %v611_v8, %v610_v34 }
 0x21c   :  { %v3042_v9 = vpop.f32.mrf.mxu0  ;;  %v570_v14 = vsel %vm543_vm7, %v569_v54, %v491_v19  ;;  %v614_v16 = vadd.f32 %v613_v36, %v612_v51  ;;  %v1860_v54 = vld [vmem:[#allocation2] ss:$0 sm:$0xff] }
 0x21d   :  { %v617_v10 = vsel %vm591_vm8, %v570_v14, 0.0  ;;  %v1498_v15 = vadd.f32 %v3042_v9, %v1398_v57 }
 0x21e   :  { %v2103_v60 = vpop.f32.mrf.mxu0 }
 0x21f   :  { %v616_v60 = vadd.f32 %v615_v1, %v614_v16  ;;  %v1585_v37 = vadd.f32 %v3002_v25, %v1498_v15 }
 0x221   :  { %v618_v63 = vadd.f32 %v617_v10, %v616_v60 }
 0x223   :  { %v620_v31 = vadd.f32 %v619_v53, %v618_v63 }
 0x225   :  { %v622_v0 = vadd.f32 %v621_v45, %v620_v31 }
 0x227   :  { %623 = vadd.xlane.f32.xlu0 %v622_v0 }
 0x231   :  { %v1782_v20 = vpop.f32.mrf.mxu1 }
 0x233   :  { %v2196_v2 = vpop.f32.mrf.mxu1 }
 0x239   :  { %v1697_v58 = vpop.f32.mrf.mxu0 }
 0x23a   :  { %v1698_v42 = vadd.f32 %v1697_v58, %v1585_v37 }
 0x23b   :  { %v2165_v32 = vpop.f32.mrf.mxu0 }
 0x23c   :  { %v1783_v61 = vadd.f32 %v1782_v20, %v1698_v42 }
 0x23e   :  { %v1787_v59 = vsel %vm1786_vm9, %v1783_v61, 0.0 }
 0x23f   :  { %v1788_v26 = vrot.slane %v1787_v59, 4 }
 0x241   :  { %v1789_v33 = vadd.f32 %v1788_v26, %v1787_v59 }
 0x243   :  { %v1790_v6 = vrot.slane %v1789_v33, 2 }
 0x245   :  { %v1791_v17 = vadd.f32 %v1790_v6, %v1789_v33 }
 0x247   :  { %v1792_v22 = vrot.slane %v1791_v17, 1 }
 0x249   :  { %v1793_v50 = vadd.f32 %v1792_v22, %v1791_v17 }
 0x24b   :  { %v1794_v30 = vmul.f32 0.5, %v1793_v50 }
 0x24d   :  { %v1795_v9 = vsub.f32 %v1783_v61, %v1794_v30 }
 0x24f   :  { %v1796_v52 = vmul.f32 %v1795_v9, %v1795_v9 }
 0x251   :  { %v1797_v18 = vsel %vm1786_vm9, %v1796_v52, 0.0 }
 0x252   :  { %v1798_v25 = vrot.slane %v1797_v18, 4 }
 0x254   :  { %v1799_v41 = vadd.f32 %v1798_v25, %v1797_v18 }
 0x256   :  { %v1800_v4 = vrot.slane %v1799_v41, 2 }
 0x258   :  { %v1801_v21 = vadd.f32 %v1800_v4, %v1799_v41 }
 0x25a   :  { %v1802_v27 = vrot.slane %v1801_v21, 1 }
 0x25c   :  { %v1803_v12 = vadd.f32 %v1802_v27, %v1801_v21 }
 0x25e   :  { %v1804_v28 = vmul.f32 0.5, %v1803_v12 }
 0x260   :  { %v1805_v38 = vadd.f32 1e-05, %v1804_v28 }
 0x262   :  { %2221 = vrsqrt.f32 %v1805_v38 }
 0x26f   :  { %v2222_v55 = vpop.eup %2221 }
 0x270   :  { %v1807_v3 = vmul.f32 %v2222_v55, %v1795_v9 }
 0x272   :  { %v1815_v7 = vmul.f32 %v1857_v39, %v1807_v3 }
 0x274   :  { %v1823_v23 = vadd.f32 %v1858_v49, %v1815_v7 }
 0x276   :  { %v1824_v19 = vmax.f32 %v1823_v23, 0.0 }
 0x278   :  { %v1832_v62 = vmul.f32 %v1859_v56, %v1824_v19 }
 0x27a   :  { %v1833_v13 = vsel %vm1786_vm9, %v1832_v62, 0.0 }
 0x27b   :  { %1834 = vadd.xlane.f32.xlu0 %v1833_v13 }
 0x2b0   :  { %v624_v47 = vpop.xlane.xlu0 %623 }
 0x304   :  { %v1835_v29 = vpop.xlane.xlu0 %1834 }
 0x305   :  { %v1836_v8 = vadd.f32 %v1835_v29, %v624_v47 }
 0x307   :  { %v1844_v48 = vadd.f32 %v1860_v54, %v1836_v8 }
 0x309   :  { %1846 = vst.msk [vmem:[%s3126_s13] sm:$0x3] %vm1845_vm10, %v1844_v48 }
 0x30a   :  { %1851 = vsyncpa [#allocation4], 1 }
 0x30b   :  { %1852 = vsyncpa [#allocation6], 1 }

</bundles_post_ra>
